<compile_context>
chip_gen: v6e
topology: v6e:2x2x1
jax: 0.10.0
libtpu: 0.0.40
codegen_flags: <defaults>
</compile_context>

<pallas_src>
import jax
import jax.numpy as jnp
from jax.experimental import pallas as pl
from jax.experimental.pallas import tpu as pltpu


# ----------------------------------------------------------------------------
# Kernel
# ----------------------------------------------------------------------------
def _act_kernel(x_ref, o_ref):
    x = x_ref[...]
    zero = jnp.array(0, dtype=x.dtype)          # no dtype promotion for bf16/f16
    o_ref[...] = jnp.maximum(x, zero).astype(o_ref.dtype)


# ----------------------------------------------------------------------------
# Tile derivation
# ----------------------------------------------------------------------------
def _round_down_multiple(x, m):
    return (x // m) * m


def _derive_tiles(b, d, itemsize, vmem_limit_bytes):
    """Pick (tile_b, tile_d) that (a) are lane/sublane friendly and (b) keep
    double-buffered in+out tiles comfortably inside the scoped VMEM limit."""
    # 2 buffers x (input tile + output tile) live at once; keep ~2x headroom
    # for compiler scratch -> budget per tile = limit / 8.
    tile_budget = max(vmem_limit_bytes // 8, 8 * 128 * itemsize)

    # Lane (last) axis: keep it as wide as possible (lane-dense stores).
    if d * 8 * itemsize <= tile_budget:
        tile_d = d                                          # full width fits
    else:
        tile_d = max(128, _round_down_multiple(tile_budget // (8 * itemsize), 128))

    # Sublane axis: fill the remaining tile budget, multiple of 8.
    tile_b = max(8, _round_down_multiple(tile_budget // (tile_d * itemsize), 8))
    if tile_b >= b:
        tile_b = b                                          # full-extent block is always legal

    # v7x has 2 TensorCores: give the grid >= 2 steps when the tensor is big
    # enough for the split to matter.
    if tile_b == b and b > 8 and (b * d * itemsize) > (1 << 20):
        half = _round_down_multiple(pl.cdiv(b, 2), 8)
        if half >= 8:
            tile_b = half

    return tile_b, tile_d


# ----------------------------------------------------------------------------
# Wrapper
# ----------------------------------------------------------------------------
def aggregator_act(x, *, tile_b=None, tile_d=None,
                   vmem_limit_bytes=32 * 1024 * 1024):
    """Elementwise activation (ReLU) hot path on a (batch, dim) tensor."""
    b, d = x.shape
    itemsize = jnp.dtype(x.dtype).itemsize

    auto_b, auto_d = _derive_tiles(b, d, itemsize, vmem_limit_bytes)
    tb = min(auto_b if tile_b is None else tile_b, b)
    td = min(auto_d if tile_d is None else tile_d, d)

    grid = (pl.cdiv(b, tb), pl.cdiv(d, td))     # partial edge blocks are masked

    cost = pl.CostEstimate(flops=b * d,
                           transcendentals=0,
                           bytes_accessed=2 * b * d * itemsize)

    return pl.pallas_call(
        _act_kernel,
        out_shape=jax.ShapeDtypeStruct((b, d), x.dtype),
        grid_spec=pltpu.PrefetchScalarGridSpec(
            num_scalar_prefetch=0,
            grid=grid,
            in_specs=[pl.BlockSpec((tb, td), lambda i, j: (i, j))],
            out_specs=pl.BlockSpec((tb, td), lambda i, j: (i, j)),
        ),
        compiler_params=pltpu.CompilerParams(
            dimension_semantics=("parallel", "parallel"),
            vmem_limit_bytes=vmem_limit_bytes,
        ),
        cost_estimate=cost,
    )(x)


# ----------------------------------------------------------------------------
# Module
# ----------------------------------------------------------------------------
class Aggregator:
    """JAX port of algorithms/CM_HGCN/aggregator.py::Aggregator."""

    def __init__(self, batch_size, dim, dropout, act, name=None):
        self.dropout = dropout
        self.act = act
        self.batch_size = batch_size
        self.dim = dim
        # No parameters are defined in the reference __init__.
        # TODO(synk): `dropout` is stored but never applied anywhere in the
        # reference module; subclasses (e.g. LocalAggregator) hold the real
        # compute and are out of scope here.

    def forward(self):
        # Reference forward() is `pass` -> returns None.  Exact match.
        return None


# ----------------------------------------------------------------------------
# Demo / checks
# ----------------------------------------------------------------------------
if __name__ == "__main__":
    batch_size, dim = 8, 128
    dropout, act = 0.0, "relu"

    agg = Aggregator(batch_size, dim, dropout, act)

    # Exact forward semantics: no-op.
    assert agg.forward() is None

    key = jax.random.PRNGKey(0)

    # 1) Basic path: (8, 128) f32, auto-derived tiles (single block).
    x0 = jax.random.normal(key, (batch_size, dim), dtype=jnp.float32)
    out0 = jax.block_until_ready(aggregator_act(x0))
    assert out0.shape == x0.shape
    assert jnp.allclose(out0, jnp.maximum(x0, 0.0), atol=1e-6, rtol=1e-6)

    # 2) Ragged batch + 2-D grid: (20, 256) f32 with forced small tiles so the
    #    cdiv grid and masked partial edge blocks are exercised.
    k1, k2 = jax.random.split(key)
    x1 = jax.random.normal(k1, (20, 256), dtype=jnp.float32)
    out1 = jax.block_until_ready(aggregator_act(x1, tile_b=8, tile_d=128))
    assert out1.shape == x1.shape
    assert jnp.allclose(out1, jnp.maximum(x1, 0.0), atol=1e-6, rtol=1e-6)

    # 3) Low-precision path: bf16 input, sublane count a multiple of 16, no
    #    dtype promotion inside the kernel.
    x2 = jax.random.normal(k2, (16, 128), dtype=jnp.bfloat16)
    out2 = jax.block_until_ready(aggregator_act(x2))
    assert out2.dtype == jnp.bfloat16
    assert jnp.allclose(out2.astype(jnp.float32),
                        jnp.maximum(x2.astype(jnp.float32), 0.0),
                        atol=1e-2, rtol=1e-2)

    print("KERNEL_OK")
</pallas_src>

<mosaic_0001>
module attributes {stable_mosaic.version = 11 : i64} {
  func.func @_act_kernel(%arg0: i32, %arg1: i32, %arg2: memref<8x128xf32, #tpu.memory_space<vmem>>, %arg3: memref<8x128xf32, #tpu.memory_space<vmem>>) attributes {dimension_semantics = [#tpu.dimension_semantics<parallel>, #tpu.dimension_semantics<parallel>], iteration_bounds = array<i64: 1, 1>, scalar_prefetch = 0 : i64, scratch_operands = 0 : i64, tpu.core_type = #tpu.core_type<tc>, window_params = [{transform_indices = @transform_0, window_bounds = array<i64: 8, 128>}, {transform_indices = @transform_1, window_bounds = array<i64: 8, 128>}]} {
    %c0 = arith.constant 0 : index
    %c0_0 = arith.constant 0 : index
    %0 = vector.load %arg2[%c0, %c0_0] : memref<8x128xf32, #tpu.memory_space<vmem>>, vector<8x128xf32>
    %cst = arith.constant 0.000000e+00 : f32
    %1 = vector.broadcast %cst : f32 to vector<8x128xf32>
    %2 = arith.maximumf %0, %1 : vector<8x128xf32>
    %c0_1 = arith.constant 0 : index
    %c0_2 = arith.constant 0 : index
    %3 = vector.load %arg3[%c0_1, %c0_2] : memref<8x128xf32, #tpu.memory_space<vmem>>, vector<8x128xf32>
    tpu.vector_store %arg3[%c0_1, %c0_2], %2 {strides = array<i32>} : memref<8x128xf32, #tpu.memory_space<vmem>>, vector<8x128xf32>,
    return
  }
  func.func @transform_0(%arg0: i32, %arg1: i32) -> (i32, i32) {
    %c0_i32 = arith.constant 0 : i32
    return %arg0, %arg1 : i32, i32
  }
  func.func @transform_1(%arg0: i32, %arg1: i32) -> (i32, i32) {
    %c0_i32 = arith.constant 0 : i32
    return %arg0, %arg1 : i32, i32
  }
}

</mosaic_0001>

<bundles_post_ra>
// kernel: tpu_custom_call.1
= control target key start
LH: loop header
LB: loop body
LE: loop exit
PB: predicated region body
PF: predicated region fallthrough
CT: control target
= control target key end

     0   :  { %6 = vsyncpa [#allocation3], 0  ;;  %s103_s0 = inlined_call_operand.hbm [shape: f32[8,128], index: 0, kind: input, shape index: {}]   ;;  %s104_s1 = inlined_call_operand.hbm [shape: f32[8,128], index: 1, kind: output, shape index: {}]  }
   0x1   :  { %7 = vsyncpa [#allocation4], 0  ;;  %s85_s6 = smov [#allocation2]  }
   0x2   :  { %s14_s7 = sshll.u32 %s85_s6, 4  ;;  %s15_s7 = int_to_ptr.vmem [resolvable:$true] %s14_s7 }
   0x3   :  { %s49_s8 = scalar_lea.vmem %s15_s7, 128  ;;  %p54_p1 = scmp.lt.s32.totalorder %s15_s7, %s15_s7 }
   0x4   :  { %p50_p0 = scmp.ne.s32.totalorder %s15_s7, %s49_s8  ;;  %p55_p2 = scmp.lt.s32.totalorder %s49_s8, %s49_s8 }
   0x6   :  { %p56_p3 = por %p55_p2, %p54_p1 }
   0x8   :  { %p57_p4 = pnand %p56_p3, %p50_p0 }
   0xa   :  { %60 = shalt.err (!%p57_p4)
}
   0xb   :  { %17 = dma.hbm_to_vmem [thread:$0]  %s103_s0, 128, %s15_s7, [#allocation3]  }
   0xc   :  { %81 = dma.done.wait [#allocation3], 128  }
   0xd   :  { %82 = vsyncadd [#allocation3], 4294967168  ;;  %s86_s11 = smov [#allocation5]   ;;  %v21_v0 = vld [vmem:[#allocation2] sm:$0xff] }
   0xe   :  { %s30_s12 = sshll.u32 %s86_s11, 4  ;;  %v22_v1 = vmax.f32 %v21_v0, 0.0  ;;  %s31_s12 = int_to_ptr.vmem [resolvable:$true] %s30_s12 }
   0xf   :  { %s61_s13 = scalar_lea.vmem %s31_s12, 128  ;;  %p66_p6 = scmp.lt.s32.totalorder %s31_s12, %s31_s12 }
  0x10   :  { %23 = vst [vmem:[#allocation5] sm:$0xff] %v22_v1  ;;  %p62_p5 = scmp.ne.s32.totalorder %s31_s12, %s61_s13  ;;  %p67_p7 = scmp.lt.s32.totalorder %s61_s13, %s61_s13 }
  0x12   :  { %p68_p8 = por %p67_p7, %p66_p6 }
  0x14   :  { %p69_p9 = pnand %p68_p8, %p62_p5 }
  0x16   :  { %72 = shalt.err (!%p69_p9)
}
  0x17   :  { %33 = dma.vmem_to_hbm [thread:$0]  %s31_s12, 128, %s104_s1, [#allocation4]  }
  0x18   :  { %83 = dma.done.wait [#allocation4], 128  }
  0x19   :  { %84 = vsyncadd [#allocation4], 4294967168 }
  0x1a   :  { %37 = vsyncpa [#allocation3], 1 }
  0x1b   :  { %38 = vsyncpa [#allocation4], 1 }

</bundles_post_ra>
